<compile_context>
chip_gen: v6e
topology: v6e:2x2x1
jax: 0.10.0
libtpu: 0.0.40
codegen_flags: <defaults>
</compile_context>

<pallas_src>
import jax
import jax.numpy as jnp
from jax.experimental import pallas as pl
from jax.experimental.pallas import tpu as pltpu

NODE_EMB = 128   # node_emb_size in the reference module
H1 = 128         # conv1 out
H2 = 32          # conv2 out
H3 = 16          # fc1 out
LANES = 128      # lane width of the lane-dense output slab


def gcn_kernel(a_ref, x_ref, p_ref,
               w1_ref, b1_ref, w2_ref, b2_ref,
               wf1_ref, bf1_ref, wf2_ref, bf2_ref,
               o_ref):
    """Forward for one grid step (NB graph-batches merged block-diagonally).

    a_ref  : (M, M)   bf16  block-diagonal normalized adjacency, M = NB*N
    x_ref  : (M, F)   bf16  node features (NB batches stacked along rows)
    p_ref  : (GG, M)  f32   block-diagonal mean-pool matrix, GG = NB*G
    w*/b*  : weights, resident across the grid (constant index_map)
    o_ref  : (GG, 128) f32  lane-dense output (per-graph scalar over lanes)
    """
    gg = p_ref.shape[0]
    lanes = o_ref.shape[1]

    a = a_ref[...]                                   # bf16; stays bf16 for MXU

    # --- GCNConv1: relu( A_hat @ (x @ W1) + b1 ) --------------------------
    xw = jnp.dot(x_ref[...], w1_ref[...],
                 preferred_element_type=jnp.float32)               # (M, H1) f32
    h = jnp.dot(a, xw.astype(jnp.bfloat16),
                preferred_element_type=jnp.float32)                # bf16 x bf16
    h = jnp.maximum(h + b1_ref[...], 0.0)                          # (M, H1) f32

    # --- GCNConv2: relu( A_hat @ (h @ W2) + b2 ) --------------------------
    # Project to H2=32 *before* aggregating with A (4x fewer FLOPs in A @ ...).
    hw = jnp.dot(h.astype(jnp.bfloat16), w2_ref[...],
                 preferred_element_type=jnp.float32)               # (M, H2)
    h = jnp.dot(a, hw.astype(jnp.bfloat16),
                preferred_element_type=jnp.float32)
    h = jnp.maximum(h + b2_ref[...], 0.0)                          # (M, H2) f32

    # --- global_mean_pool via the block-diagonal pooling matrix -----------
    pooled = jnp.dot(p_ref[...], h,
                     preferred_element_type=jnp.float32)           # (GG, H2)

    # --- fc1 + tanh --------------------------------------------------------
    z = jnp.tanh(jnp.dot(pooled, wf1_ref[...],
                         preferred_element_type=jnp.float32)
                 + bf1_ref[...])                                   # (GG, H3)

    # --- fc2 + sigmoid -------------------------------------------------------
    # 1-wide output: lane reduction instead of a degenerate (H3, 1) matmul.
    y = jnp.sum(z * wf2_ref[...], axis=-1, keepdims=True) + bf2_ref[...]
    y = jax.nn.sigmoid(y)                                          # (GG, 1)

    # Lane-dense store: broadcast the per-graph scalar across all 128 lanes.
    o_ref[...] = jnp.broadcast_to(y, (gg, lanes))


# ---------------------------------------------------------------------------
# One-time setup (hoisted out of the per-call path): dtype casts + block-diag
# packing of per-batch A_hat / pool, so the kernel sees MXU-shaped operands.
# ---------------------------------------------------------------------------
def default_batches_per_step(B):
    """1 grid step on single-TC parts (v5e/v6e); 2 parallel steps on v7x."""
    try:
        kind = jax.devices()[0].device_kind.lower()
    except Exception:
        kind = ""
    steps = 2 if ("v7" in kind and B % 2 == 0) else 1
    return B // steps


def prepare_inputs(a_hat, x, pool, batches_per_step):
    """Pack B graph-batches into `steps` block-diagonal operands (bf16 A/x)."""
    B, N, _ = a_hat.shape
    G = pool.shape[1]
    F = x.shape[-1]
    nb = batches_per_step
    assert B % nb == 0, "B must be divisible by batches_per_step"
    steps = B // nb
    M, GG = nb * N, nb * G

    a_bd = jnp.zeros((steps, M, M), dtype=jnp.float32)
    p_bd = jnp.zeros((steps, GG, M), dtype=jnp.float32)
    a4 = a_hat.reshape(steps, nb, N, N)
    p4 = pool.reshape(steps, nb, G, N)
    for j in range(nb):
        a_bd = a_bd.at[:, j * N:(j + 1) * N, j * N:(j + 1) * N].set(a4[:, j])
        p_bd = p_bd.at[:, j * G:(j + 1) * G, j * N:(j + 1) * N].set(p4[:, j])

    return (a_bd.astype(jnp.bfloat16),
            x.reshape(steps, M, F).astype(jnp.bfloat16),
            p_bd)


def prepare_params(params):
    """bf16 storage for the matmul weights; row layout for the (H3,1) fc2."""
    return {
        "w1": params["w1"].astype(jnp.bfloat16),
        "b1": params["b1"],
        "w2": params["w2"].astype(jnp.bfloat16),
        "b2": params["b2"],
        "wf1": params["wf1"],
        "bf1": params["bf1"],
        "wf2_row": params["wf2"].reshape(1, -1),   # (1, H3) -> lane reduce
        "bf2": params["bf2"],
    }


def gcn_forward(a_bd, x_bd, p_bd, kp):
    """pallas_call on pre-packed operands. Returns (steps, NB*G, LANES) f32."""
    steps, M, _ = a_bd.shape
    GG = p_bd.shape[1]
    F = x_bd.shape[-1]
    h1 = kp["w1"].shape[1]
    h2 = kp["w2"].shape[1]
    h3 = kp["wf1"].shape[1]

    args = (a_bd, x_bd, p_bd,
            kp["w1"], kp["b1"], kp["w2"], kp["b2"],
            kp["wf1"], kp["bf1"], kp["wf2_row"], kp["bf2"])

    def batched(shape):      # per-step data: leading step axis squeezed out
        return pl.BlockSpec((None,) + shape, lambda i: (i, 0, 0))

    def resident(arr):       # 2-D weights: constant block index -> stays in VMEM
        return pl.BlockSpec(tuple(arr.shape), lambda i: (0, 0))

    in_specs = [batched((M, M)), batched((M, F)), batched((GG, M))]
    in_specs += [resident(a) for a in args[3:]]
    out_specs = pl.BlockSpec((None, GG, LANES), lambda i: (i, 0, 0))

    flops = 2 * steps * (M * F * h1 + M * M * h1 + M * h1 * h2 + M * M * h2
                         + GG * M * h2 + GG * h2 * h3 + GG * h3)
    cost = pl.CostEstimate(
        flops=int(flops),
        transcendentals=int(steps * GG * (h3 + 1)),
        bytes_accessed=int(sum(int(a.size) * a.dtype.itemsize for a in args)
                           + steps * GG * LANES * 4),
    )

    return pl.pallas_call(
        gcn_kernel,
        out_shape=jax.ShapeDtypeStruct((steps, GG, LANES), jnp.float32),
        grid_spec=pltpu.PrefetchScalarGridSpec(
            num_scalar_prefetch=0,
            grid=(steps,),
            in_specs=in_specs,
            out_specs=out_specs,
        ),
        # Independent steps -> shard across both TensorCores on v7x.
        compiler_params=pltpu.CompilerParams(
            dimension_semantics=("parallel",)),
        cost_estimate=cost,
    )(*args)


def gcn_apply(a_hat, x, pool, params, *, batches_per_step=None):
    """Full forward: (B, N, N), (B, N, F), (B, G, N) -> (B, G, 1) f32."""
    B = a_hat.shape[0]
    G = pool.shape[1]
    nb = batches_per_step or default_batches_per_step(B)
    # In a real model prepare_* run once at setup; they're cheap here.
    a_bd, x_bd, p_bd = prepare_inputs(a_hat, x, pool, nb)
    kp = prepare_params(params)
    out = gcn_forward(a_bd, x_bd, p_bd, kp)
    # Every lane holds the same per-graph scalar; take lane 0.
    return out.reshape(B, G, LANES)[:, :, 0:1]


# ---------------------------------------------------------------------------
# Pure-JAX reference mirroring the kernel's bf16 operand choices (isolates
# kernel correctness from the accepted bf16 quantization of A_hat/x/W1/W2).
# ---------------------------------------------------------------------------
def gcn_reference(a_hat_bf, x_bf, pool, p):
    xw = jnp.einsum("bnf,fh->bnh", x_bf, p["w1"],
                    preferred_element_type=jnp.float32)
    h = jnp.einsum("bnm,bmh->bnh", a_hat_bf, xw.astype(jnp.bfloat16),
                   preferred_element_type=jnp.float32)
    h = jnp.maximum(h + p["b1"], 0.0)
    hw = jnp.einsum("bnh,hk->bnk", h.astype(jnp.bfloat16), p["w2"],
                    preferred_element_type=jnp.float32)
    h = jnp.einsum("bnm,bmk->bnk", a_hat_bf, hw.astype(jnp.bfloat16),
                   preferred_element_type=jnp.float32)
    h = jnp.maximum(h + p["b2"], 0.0)
    g = jnp.einsum("bgn,bnk->bgk", pool, h,
                   preferred_element_type=jnp.float32)
    z = jnp.tanh(jnp.einsum("bgk,kh->bgh", g, p["wf1"],
                            preferred_element_type=jnp.float32) + p["bf1"])
    y = jnp.einsum("bgh,ho->bgo", z, p["wf2"],
                   preferred_element_type=jnp.float32) + p["bf2"]
    return jax.nn.sigmoid(y)


def build_normalized_adjacency(edge_index, num_nodes):
    """Dense A_hat = D^-1/2 (A + I) D^-1/2 (GCNConv default normalization)."""
    a = jnp.zeros((num_nodes, num_nodes), dtype=jnp.float32)
    src, dst = edge_index
    a = a.at[dst, src].add(1.0)                       # message src -> dst
    a = a + jnp.eye(num_nodes, dtype=jnp.float32)     # add self loops
    deg = jnp.sum(a, axis=1)
    d_inv_sqrt = jnp.where(deg > 0, 1.0 / jnp.sqrt(deg), 0.0)
    return d_inv_sqrt[:, None] * a * d_inv_sqrt[None, :]


def build_pool_matrix(batch, num_graphs):
    """pool[g, n] = 1 / |{n : batch[n] == g}| if batch[n] == g else 0."""
    onehot = (batch[None, :] == jnp.arange(num_graphs)[:, None]).astype(jnp.float32)
    counts = jnp.maximum(jnp.sum(onehot, axis=1, keepdims=True), 1.0)
    return onehot / counts


if __name__ == "__main__":
    key = jax.random.PRNGKey(0)
    B = 8            # graph-batches processed by one pallas_call
    N = 16           # nodes per graph-batch
    G = 2            # graphs per batch (8 nodes each)
    E = 32           # directed edges per batch

    keys = jax.random.split(key, 12)

    # Node features.
    x = jax.random.normal(keys[0], (B, N, NODE_EMB), dtype=jnp.float32)

    # Random intra-graph edge sets (one per graph-batch) -> dense A_hat per batch.
    batch_vec = jnp.repeat(jnp.arange(G), N // G)
    a_list = []
    for b in range(B):
        k1, k2, k3 = jax.random.split(jax.random.fold_in(keys[1], b), 3)
        src = jax.random.randint(k1, (E,), 0, N // G)
        dst = jax.random.randint(k2, (E,), 0, N // G)
        goe = jax.random.randint(k3, (E,), 0, G) * (N // G)
        edge_index = jnp.stack([src + goe, dst + goe], axis=0)
        a_list.append(build_normalized_adjacency(edge_index, N))
    a_hat = jnp.stack(a_list, axis=0)                                  # (B, N, N)
    pool = jnp.tile(build_pool_matrix(batch_vec, G)[None], (B, 1, 1))  # (B, G, N)

    # Parameters. GCNConv weights/biases: uniform(-1, 1) per initialize_weights();
    # fc1/fc2 keep torch's default uniform(-1/sqrt(fan_in), 1/sqrt(fan_in)).
    def u(k, shape, lo, hi):
        return jax.random.uniform(k, shape, jnp.float32, lo, hi)

    params = {
        "w1":  u(keys[2], (NODE_EMB, H1), -1.0, 1.0),
        "b1":  u(keys[3], (1, H1), -1.0, 1.0),
        "w2":  u(keys[4], (H1, H2), -1.0, 1.0),
        "b2":  u(keys[5], (1, H2), -1.0, 1.0),
        "wf1": u(keys[6], (H2, H3), -1.0 / jnp.sqrt(H2), 1.0 / jnp.sqrt(H2)),
        "bf1": u(keys[7], (1, H3), -1.0 / jnp.sqrt(H2), 1.0 / jnp.sqrt(H2)),
        "wf2": u(keys[8], (H3, 1), -1.0 / jnp.sqrt(H3), 1.0 / jnp.sqrt(H3)),
        "bf2": u(keys[9], (1, 1), -1.0 / jnp.sqrt(H3), 1.0 / jnp.sqrt(H3)),
    }

    out = gcn_apply(a_hat, x, pool, params)
    out = jax.block_until_ready(out)

    # Reference mirrors the kernel's bf16 operand choices (documented accepted
    # quantization of A_hat / x / W1 / W2 and the bf16 casts of xw / hw).
    bf = lambda v: v.astype(jnp.bfloat16)
    params_ref = dict(params)
    params_ref["w1"] = bf(params["w1"])
    params_ref["w2"] = bf(params["w2"])
    ref = gcn_reference(bf(a_hat), bf(x), pool, params_ref)

    assert out.shape == (B, G, 1), out.shape
    assert jnp.allclose(out, ref, atol=2e-3, rtol=2e-3), (out, ref)

    print("KERNEL_OK")
</pallas_src>

<mosaic_0001>
module attributes {stable_mosaic.version = 11 : i64} {
  func.func @gcn_kernel(%arg0: i32, %arg1: memref<1x128x128xbf16, #tpu.memory_space<vmem>>, %arg2: memref<1x128x128xbf16, #tpu.memory_space<vmem>>, %arg3: memref<1x16x128xf32, #tpu.memory_space<vmem>>, %arg4: memref<128x128xbf16, #tpu.memory_space<vmem>>, %arg5: memref<1x128xf32, #tpu.memory_space<vmem>>, %arg6: memref<128x32xbf16, #tpu.memory_space<vmem>>, %arg7: memref<1x32xf32, #tpu.memory_space<vmem>>, %arg8: memref<32x16xf32, #tpu.memory_space<vmem>>, %arg9: memref<1x16xf32, #tpu.memory_space<vmem>>, %arg10: memref<1x16xf32, #tpu.memory_space<vmem>>, %arg11: memref<1x1xf32, #tpu.memory_space<vmem>>, %arg12: memref<1x16x128xf32, #tpu.memory_space<vmem>>) attributes {dimension_semantics = [#tpu.dimension_semantics<parallel>], iteration_bounds = array<i64: 1>, scalar_prefetch = 0 : i64, scratch_operands = 0 : i64, tpu.core_type = #tpu.core_type<tc>, window_params = [{transform_indices = @transform_0, window_bounds = array<i64: 1, 128, 128>}, {transform_indices = @transform_1, window_bounds = array<i64: 1, 128, 128>}, {transform_indices = @transform_2, window_bounds = array<i64: 1, 16, 128>}, {pipeline_mode = #tpu.pipeline_mode<synchronous>, transform_indices = @transform_3, window_bounds = array<i64: 128, 128>}, {pipeline_mode = #tpu.pipeline_mode<synchronous>, transform_indices = @transform_4, window_bounds = array<i64: 1, 128>}, {pipeline_mode = #tpu.pipeline_mode<synchronous>, transform_indices = @transform_5, window_bounds = array<i64: 128, 32>}, {pipeline_mode = #tpu.pipeline_mode<synchronous>, transform_indices = @transform_6, window_bounds = array<i64: 1, 32>}, {pipeline_mode = #tpu.pipeline_mode<synchronous>, transform_indices = @transform_7, window_bounds = array<i64: 32, 16>}, {pipeline_mode = #tpu.pipeline_mode<synchronous>, transform_indices = @transform_8, window_bounds = array<i64: 1, 16>}, {pipeline_mode = #tpu.pipeline_mode<synchronous>, transform_indices = @transform_9, window_bounds = array<i64: 1, 16>}, {pipeline_mode = #tpu.pipeline_mode<synchronous>, transform_indices = @transform_10, window_bounds = array<i64: 1, 1>}, {transform_indices = @transform_11, window_bounds = array<i64: 1, 16, 128>}]} {
    %c0 = arith.constant 0 : index
    %c0_0 = arith.constant 0 : index
    %c0_1 = arith.constant 0 : index
    %0 = vector.load %arg1[%c0, %c0_0, %c0_1] : memref<1x128x128xbf16, #tpu.memory_space<vmem>>, vector<1x128x128xbf16>
    %1 = vector.shape_cast %0 : vector<1x128x128xbf16> to vector<128x128xbf16>
    %c0_2 = arith.constant 0 : index
    %c0_3 = arith.constant 0 : index
    %c0_4 = arith.constant 0 : index
    %2 = vector.load %arg2[%c0_2, %c0_3, %c0_4] : memref<1x128x128xbf16, #tpu.memory_space<vmem>>, vector<1x128x128xbf16>
    %3 = vector.shape_cast %2 : vector<1x128x128xbf16> to vector<128x128xbf16>
    %c0_5 = arith.constant 0 : index
    %c0_6 = arith.constant 0 : index
    %4 = vector.load %arg4[%c0_5, %c0_6] : memref<128x128xbf16, #tpu.memory_space<vmem>>, vector<128x128xbf16>
    %cst = arith.constant dense<0.000000e+00> : vector<128x128xf32>
    %5 = tpu.matmul %3, %4, %cst {dimension_numbers = #tpu.dot_dimension_numbers<[1], [0], [0], [1], [0, 0, 1, 1], [], []>} : vector<128x128xbf16>, vector<128x128xbf16>, vector<128x128xf32> -> vector<128x128xf32>
    %6 = arith.truncf %5 : vector<128x128xf32> to vector<128x128xbf16>
    %cst_7 = arith.constant dense<0.000000e+00> : vector<128x128xf32>
    %7 = tpu.matmul %1, %6, %cst_7 {dimension_numbers = #tpu.dot_dimension_numbers<[1], [0], [0], [1], [0, 0, 1, 1], [], []>} : vector<128x128xbf16>, vector<128x128xbf16>, vector<128x128xf32> -> vector<128x128xf32>
    %c0_8 = arith.constant 0 : index
    %c0_9 = arith.constant 0 : index
    %8 = vector.load %arg5[%c0_8, %c0_9] : memref<1x128xf32, #tpu.memory_space<vmem>>, vector<1x128xf32>
    %9 = vector.broadcast %8 : vector<1x128xf32> to vector<128x128xf32>
    %10 = arith.addf %7, %9 : vector<128x128xf32>
    %cst_10 = arith.constant 0.000000e+00 : f32
    %11 = vector.broadcast %cst_10 : f32 to vector<128x128xf32>
    %12 = arith.maximumf %10, %11 : vector<128x128xf32>
    %13 = arith.truncf %12 : vector<128x128xf32> to vector<128x128xbf16>
    %c0_11 = arith.constant 0 : index
    %c0_12 = arith.constant 0 : index
    %14 = vector.load %arg6[%c0_11, %c0_12] : memref<128x32xbf16, #tpu.memory_space<vmem>>, vector<128x32xbf16>
    %cst_13 = arith.constant dense<0.000000e+00> : vector<128x32xf32>
    %15 = tpu.matmul %13, %14, %cst_13 {dimension_numbers = #tpu.dot_dimension_numbers<[1], [0], [0], [1], [0, 0, 1, 1], [], []>} : vector<128x128xbf16>, vector<128x32xbf16>, vector<128x32xf32> -> vector<128x32xf32>
    %16 = arith.truncf %15 : vector<128x32xf32> to vector<128x32xbf16>
    %cst_14 = arith.constant dense<0.000000e+00> : vector<128x32xf32>
    %17 = tpu.matmul %1, %16, %cst_14 {dimension_numbers = #tpu.dot_dimension_numbers<[1], [0], [0], [1], [0, 0, 1, 1], [], []>} : vector<128x128xbf16>, vector<128x32xbf16>, vector<128x32xf32> -> vector<128x32xf32>
    %c0_15 = arith.constant 0 : index
    %c0_16 = arith.constant 0 : index
    %18 = vector.load %arg7[%c0_15, %c0_16] : memref<1x32xf32, #tpu.memory_space<vmem>>, vector<1x32xf32>
    %19 = vector.broadcast %18 : vector<1x32xf32> to vector<128x32xf32>
    %20 = arith.addf %17, %19 : vector<128x32xf32>
    %cst_17 = arith.constant 0.000000e+00 : f32
    %21 = vector.broadcast %cst_17 : f32 to vector<128x32xf32>
    %22 = arith.maximumf %20, %21 : vector<128x32xf32>
    %c0_18 = arith.constant 0 : index
    %c0_19 = arith.constant 0 : index
    %c0_20 = arith.constant 0 : index
    %23 = vector.load %arg3[%c0_18, %c0_19, %c0_20] : memref<1x16x128xf32, #tpu.memory_space<vmem>>, vector<1x16x128xf32>
    %24 = vector.shape_cast %23 : vector<1x16x128xf32> to vector<16x128xf32>
    %cst_21 = arith.constant dense<0.000000e+00> : vector<16x32xf32>
    %25 = tpu.matmul %24, %22, %cst_21 {dimension_numbers = #tpu.dot_dimension_numbers<[1], [0], [0], [1], [0, 0, 1, 1], [], []>} : vector<16x128xf32>, vector<128x32xf32>, vector<16x32xf32> -> vector<16x32xf32>
    %c0_22 = arith.constant 0 : index
    %c0_23 = arith.constant 0 : index
    %26 = vector.load %arg8[%c0_22, %c0_23] : memref<32x16xf32, #tpu.memory_space<vmem>>, vector<32x16xf32>
    %cst_24 = arith.constant dense<0.000000e+00> : vector<16x16xf32>
    %27 = tpu.matmul %25, %26, %cst_24 {dimension_numbers = #tpu.dot_dimension_numbers<[1], [0], [0], [1], [0, 0, 1, 1], [], []>} : vector<16x32xf32>, vector<32x16xf32>, vector<16x16xf32> -> vector<16x16xf32>
    %c0_25 = arith.constant 0 : index
    %c0_26 = arith.constant 0 : index
    %28 = vector.load %arg9[%c0_25, %c0_26] : memref<1x16xf32, #tpu.memory_space<vmem>>, vector<1x16xf32>
    %29 = vector.broadcast %28 : vector<1x16xf32> to vector<16x16xf32>
    %30 = arith.addf %27, %29 : vector<16x16xf32>
    %31 = math.tanh %30 : vector<16x16xf32>
    %c0_27 = arith.constant 0 : index
    %c0_28 = arith.constant 0 : index
    %32 = vector.load %arg10[%c0_27, %c0_28] : memref<1x16xf32, #tpu.memory_space<vmem>>, vector<1x16xf32>
    %33 = vector.broadcast %32 : vector<1x16xf32> to vector<16x16xf32>
    %34 = arith.mulf %31, %33 : vector<16x16xf32>
    %cst_29 = arith.constant dense<0.000000e+00> : vector<16xf32>
    %35 = vector.multi_reduction <add>, %34, %cst_29 [1] : vector<16x16xf32> to vector<16xf32>
    %36 = vector.shape_cast %35 : vector<16xf32> to vector<16x1xf32>
    %c0_30 = arith.constant 0 : index
    %c0_31 = arith.constant 0 : index
    %37 = vector.load %arg11[%c0_30, %c0_31] : memref<1x1xf32, #tpu.memory_space<vmem>>, vector<1x1xf32>
    %38 = vector.broadcast %37 : vector<1x1xf32> to vector<16x1xf32>
    %39 = arith.addf %36, %38 : vector<16x1xf32>
    %40 = arith.negf %39 : vector<16x1xf32>
    %41 = math.exp %40 : vector<16x1xf32>
    %cst_32 = arith.constant 1.000000e+00 : f32
    %42 = vector.broadcast %cst_32 : f32 to vector<16x1xf32>
    %43 = arith.addf %42, %41 : vector<16x1xf32>
    %44 = arith.divf %42, %43 : vector<16x1xf32>
    %45 = vector.shape_cast %44 : vector<16x1xf32> to vector<16x1xf32>
    %46 = vector.broadcast %45 : vector<16x1xf32> to vector<16x128xf32>
    %c0_33 = arith.constant 0 : index
    %c0_34 = arith.constant 0 : index
    %c0_35 = arith.constant 0 : index
    %47 = vector.load %arg12[%c0_33, %c0_34, %c0_35] : memref<1x16x128xf32, #tpu.memory_space<vmem>>, vector<1x16x128xf32>
    %48 = vector.shape_cast %47 : vector<1x16x128xf32> to vector<16x128xf32>
    %49 = vector.shape_cast %46 : vector<16x128xf32> to vector<1x16x128xf32>
    tpu.vector_store %arg12[%c0_33, %c0_34, %c0_35], %49 {strides = array<i32>} : memref<1x16x128xf32, #tpu.memory_space<vmem>>, vector<1x16x128xf32>,
    return
  }
  func.func @transform_0(%arg0: i32) -> (i32, i32, i32) {
    %c0_i32 = arith.constant 0 : i32
    %c0_i32_0 = arith.constant 0 : i32
    %c0_i32_1 = arith.constant 0 : i32
    return %arg0, %c0_i32, %c0_i32_0 : i32, i32, i32
  }
  func.func @transform_1(%arg0: i32) -> (i32, i32, i32) {
    %c0_i32 = arith.constant 0 : i32
    %c0_i32_0 = arith.constant 0 : i32
    %c0_i32_1 = arith.constant 0 : i32
    return %arg0, %c0_i32, %c0_i32_0 : i32, i32, i32
  }
  func.func @transform_2(%arg0: i32) -> (i32, i32, i32) {
    %c0_i32 = arith.constant 0 : i32
    %c0_i32_0 = arith.constant 0 : i32
    %c0_i32_1 = arith.constant 0 : i32
    return %arg0, %c0_i32, %c0_i32_0 : i32, i32, i32
  }
  func.func @transform_3(%arg0: i32) -> (i32, i32) {
    %c0_i32 = arith.constant 0 : i32
    %c0_i32_0 = arith.constant 0 : i32
    %c0_i32_1 = arith.constant 0 : i32
    return %c0_i32, %c0_i32_0 : i32, i32
  }
  func.func @transform_4(%arg0: i32) -> (i32, i32) {
    %c0_i32 = arith.constant 0 : i32
    %c0_i32_0 = arith.constant 0 : i32
    %c0_i32_1 = arith.constant 0 : i32
    return %c0_i32, %c0_i32_0 : i32, i32
  }
  func.func @transform_5(%arg0: i32) -> (i32, i32) {
    %c0_i32 = arith.constant 0 : i32
    %c0_i32_0 = arith.constant 0 : i32
    %c0_i32_1 = arith.constant 0 : i32
    return %c0_i32, %c0_i32_0 : i32, i32
  }
  func.func @transform_6(%arg0: i32) -> (i32, i32) {
    %c0_i32 = arith.constant 0 : i32
    %c0_i32_0 = arith.constant 0 : i32
    %c0_i32_1 = arith.constant 0 : i32
    return %c0_i32, %c0_i32_0 : i32, i32
  }
  func.func @transform_7(%arg0: i32) -> (i32, i32) {
    %c0_i32 = arith.constant 0 : i32
    %c0_i32_0 = arith.constant 0 : i32
    %c0_i32_1 = arith.constant 0 : i32
    return %c0_i32, %c0_i32_0 : i32, i32
  }
  func.func @transform_8(%arg0: i32) -> (i32, i32) {
    %c0_i32 = arith.constant 0 : i32
    %c0_i32_0 = arith.constant 0 : i32
    %c0_i32_1 = arith.constant 0 : i32
    return %c0_i32, %c0_i32_0 : i32, i32
  }
  func.func @transform_9(%arg0: i32) -> (i32, i32) {
    %c0_i32 = arith.constant 0 : i32
    %c0_i32_0 = arith.constant 0 : i32
    %c0_i32_1 = arith.constant 0 : i32
    return %c0_i32, %c0_i32_0 : i32, i32
  }
  func.func @transform_10(%arg0: i32) -> (i32, i32) {
    %c0_i32 = arith.constant 0 : i32
    %c0_i32_0 = arith.constant 0 : i32
    %c0_i32_1 = arith.constant 0 : i32
    return %c0_i32, %c0_i32_0 : i32, i32
  }
  func.func @transform_11(%arg0: i32) -> (i32, i32, i32) {
    %c0_i32 = arith.constant 0 : i32
    %c0_i32_0 = arith.constant 0 : i32
    %c0_i32_1 = arith.constant 0 : i32
    return %arg0, %c0_i32, %c0_i32_0 : i32, i32, i32
  }
}

</mosaic_0001>

<bundles_post_ra>
// kernel: tpu_custom_call.1
= control target key start
LH: loop header
LB: loop body
LE: loop exit
PB: predicated region body
PF: predicated region fallthrough
CT: control target
= control target key end

     0   :  { %s1666_s0 = inlined_call_operand.vmem [shape: bf16[1,128,128], index: 0, kind: input, shape index: {}]   ;;  %s1667_s1 = inlined_call_operand.vmem [shape: bf16[1,128,128], index: 1, kind: input, shape index: {}]   ;;  %s1668_s2 = inlined_call_operand.hbm [shape: f32[1,16,128], index: 2, kind: input, shape index: {}]   ;;  %s1669_s3 = inlined_call_operand.hbm [shape: bf16[128,128], index: 3, kind: input, shape index: {}]   ;;  %s1670_s4 = inlined_call_operand.vmem [shape: f32[1,128], index: 4, kind: input, shape index: {}]   ;;  %s1671_s5 = inlined_call_operand.vmem [shape: bf16[128,32], index: 5, kind: input, shape index: {}]   ;;  %s1672_s6 = inlined_call_operand.vmem [shape: f32[1,32], index: 6, kind: input, shape index: {}]   ;;  %s1673_s7 = inlined_call_operand.vmem [shape: f32[32,16], index: 7, kind: input, shape index: {}]   ;;  %s1674_s8 = inlined_call_operand.vmem [shape: f32[1,16], index: 8, kind: input, shape index: {}]   ;;  %s1675_s9 = inlined_call_operand.vmem [shape: f32[1,16], index: 9, kind: input, shape index: {}]   ;;  %s1676_s10 = inlined_call_operand.<no memory space> [shape: f32[1,1], index: 10, kind: input, shape index: {}]   ;;  %s1677_s11 = inlined_call_operand.hbm [shape: f32[1,16,128], index: 11, kind: output, shape index: {}]  }
   0x1   :  { %v16_v0 = vstv %s1676_s10 }
   0x2   :  { %17 = vst [vmem:[#allocation2] sm:$0x1] %v16_v0 }
   0x3   :  { %18 = vsyncpa [#allocation4], 0 }
   0x4   :  { %19 = vsyncpa [#allocation7], 0 }
   0x5   :  { %20 = vsyncpa [#allocation5], 0  ;;  %s1446_s19 = smov [#allocation3]  }
   0x6   :  { %s30_s20 = sshll.u32 %s1446_s19, 4  ;;  %s31_s20 = int_to_ptr.vmem [resolvable:$true] %s30_s20 }
   0x7   :  { %s1388_s21 = scalar_lea.vmem %s31_s20, 256  ;;  %p1393_p1 = scmp.lt.s32.totalorder %s31_s20, %s31_s20 }
   0x8   :  { %p1389_p0 = scmp.ne.s32.totalorder %s31_s20, %s1388_s21  ;;  %p1394_p2 = scmp.lt.s32.totalorder %s1388_s21, %s1388_s21 }
   0xa   :  { %p1395_p3 = por %p1394_p2, %p1393_p1 }
   0xc   :  { %p1396_p4 = pnand %p1395_p3, %p1389_p0 }
   0xe   :  { %1399 = shalt.err (!%p1396_p4)
}
   0xf   :  { %s1447_s22 = smov 128   ;;  %s1448_s23 = smov 8  }
  0x10   :  { %36 = dma.hbm_to_vmem [thread:$0]  %s1668_s2, 256, %s31_s20, [#allocation4], %s1447_s22, %s1447_s22, %s1448_s23  }
  0x11   :  { %s1449_s25 = smov [#allocation6]  }
  0x12   :  { %s42_s26 = sshll.u32 %s1449_s25, 4  ;;  %s43_s26 = int_to_ptr.vmem [resolvable:$true] %s42_s26 }
  0x13   :  { %s1408_s27 = scalar_lea.vmem %s43_s26, 1024  ;;  %p1413_p6 = scmp.lt.s32.totalorder %s43_s26, %s43_s26 }
  0x14   :  { %p1409_p5 = scmp.ne.s32.totalorder %s43_s26, %s1408_s27  ;;  %p1414_p7 = scmp.lt.s32.totalorder %s1408_s27, %s1408_s27 }
  0x16   :  { %p1415_p8 = por %p1414_p7, %p1413_p6 }
  0x18   :  { %p1416_p9 = pnand %p1415_p8, %p1409_p5 }
  0x1a   :  { %1419 = shalt.err (!%p1416_p9)
}
  0x1b   :  { %s1450_s28 = smov 64   ;;  %s1451_s29 = smov 4  }
  0x1c   :  { %48 = dma.hbm_to_vmem [thread:$0]  %s1669_s3, 1024, %s43_s26, [#allocation7], %s1450_s28, %s1450_s28, %s1451_s29  }
  0x1d   :  { %1440 = dma.done.wait [#allocation4], 256  }
  0x1e   :  { %1441 = vsyncadd [#allocation4], 4294967040 }
  0x1f   :  { %1442 = dma.done.wait [#allocation7], 1024  }
  0x20   :  { %1443 = vsyncadd [#allocation7], 4294966272  ;;  %v1336_v1 = vld [vmem:[#allocation6 + $0x38] sm:$0xff]   ;;  %v1337_v2 = vld [vmem:[#allocation6 + $0x30] sm:$0xff]   ;;  %vm872_vm0 = vcmask 261120   ;;  %vm965_vm1 = vcmask 130048  }
  0x21   :  { %1152 = vmatprep.subr.bf16.mxu0 %v1336_v1  ;;  %v1338_v3 = vld [vmem:[#allocation6 + $0x28] sm:$0xff]   ;;  %v1339_v4 = vld [vmem:[#allocation6 + $0x20] sm:$0xff]   ;;  %v1340_v6 = vld [vmem:[#allocation6 + $0x18] sm:$0xff]  }
  0x22   :  { %1153 = vmatpush3.bf16.msra.mxu0 %v1336_v1  ;;  %v1344_v5 = vld [vmem:[%s1667_s1] sm:$0xff]   ;;  %v1343_v9 = vld [vmem:[#allocation6] sm:$0xff]   ;;  %v1345_v10 = vld [vmem:[%s1667_s1 + $0x8] sm:$0xff]  }
  0x23   :  { %1154 = vmatprep.subr.bf16.mxu0 %v1337_v2  ;;  %1168 = vmatprep.mubr.bf16.mxu0 %v1344_v5  ;;  %v1341_v7 = vld [vmem:[#allocation6 + $0x10] sm:$0xff]   ;;  %v1342_v8 = vld [vmem:[#allocation6 + $0x8] sm:$0xff]   ;;  %v1346_v11 = vld [vmem:[%s1667_s1 + $0x10] sm:$0xff]  }
  0x24   :  { %v1347_v12 = vld [vmem:[%s1667_s1 + $0x18] sm:$0xff]   ;;  %v1348_v13 = vld [vmem:[%s1667_s1 + $0x20] sm:$0xff]   ;;  %v1349_v14 = vld [vmem:[%s1667_s1 + $0x28] sm:$0xff]  }
  0x25   :  { %v1350_v15 = vld [vmem:[%s1667_s1 + $0x30] sm:$0xff]   ;;  %v1351_v16 = vld [vmem:[%s1667_s1 + $0x38] sm:$0xff]   ;;  %v1553_v17 = vld [vmem:[%s1666_s0] sm:$0xff]  }
  0x26   :  { %1155 = vmatpush3.bf16.msra.mxu0 %v1337_v2  ;;  %1200 = vmatprep.mubr.bf16.mxu1 %v1553_v17  ;;  %v1360_v18 = vld [vmem:[%s1671_s5 + $0x38] sm:$0xff]   ;;  %v1361_v19 = vld [vmem:[%s1671_s5 + $0x30] sm:$0xff]   ;;  %v1362_v20 = vld [vmem:[%s1671_s5 + $0x28] sm:$0xff]  }
  0x27   :  { %1156 = vmatprep.subr.bf16.mxu0 %v1338_v3  ;;  %v1363_v21 = vld [vmem:[%s1671_s5 + $0x20] sm:$0xff]   ;;  %v1364_v22 = vld [vmem:[%s1671_s5 + $0x18] sm:$0xff]   ;;  %v1574_v47 = vld [vmem:[%s1666_s0 + $0x8] sm:$0xff]  }
  0x28   :  { %v1579_v48 = vld [vmem:[%s1666_s0 + $0x10] sm:$0xff]   ;;  %v1586_v49 = vld [vmem:[%s1666_s0 + $0x18] sm:$0xff]   ;;  %v1591_v50 = vld [vmem:[%s1666_s0 + $0x20] sm:$0xff]  }
  0x29   :  { %v1598_v51 = vld [vmem:[%s1666_s0 + $0x28] sm:$0xff]   ;;  %v1603_v52 = vld [vmem:[%s1666_s0 + $0x30] sm:$0xff]   ;;  %v1610_v53 = vld [vmem:[%s1666_s0 + $0x38] sm:$0xff]  }
  0x2a   :  { %1157 = vmatpush3.bf16.msra.mxu0 %v1338_v3  ;;  %v1365_v54 = vld [vmem:[%s1671_s5 + $0x10] sm:$0xff]   ;;  %v1366_v55 = vld [vmem:[%s1671_s5 + $0x8] sm:$0xff]   ;;  %v1367_v56 = vld [vmem:[%s1671_s5] sm:$0xff]  }
  0x2b   :  { %1158 = vmatprep.subr.bf16.mxu0 %v1339_v4  ;;  %v1039_v59 = vld [vmem:[%s1670_s4] ss:$0 sm:$0xff] }
  0x2e   :  { %1159 = vmatpush3.bf16.msra.mxu0 %v1339_v4 }
  0x2f   :  { %1160 = vmatprep.subr.bf16.mxu0 %v1340_v6 }
  0x32   :  { %1161 = vmatpush3.bf16.msra.mxu0 %v1340_v6 }
  0x33   :  { %1162 = vmatprep.subr.bf16.mxu0 %v1341_v7 }
  0x36   :  { %1163 = vmatpush3.bf16.msra.mxu0 %v1341_v7 }
  0x37   :  { %1164 = vmatprep.subr.bf16.mxu0 %v1342_v8 }
  0x3a   :  { %1165 = vmatpush3.bf16.msra.mxu0 %v1342_v8 }
  0x3b   :  { %1166 = vmatprep.subr.bf16.mxu0 %v1343_v9 }
  0x3e   :  { %1167 = vmatpush3.bf16.msra.mxu0 %v1343_v9 }
  0x3f   :  { %1216 = vmatprep.subr.bf16.mxu0 %v1360_v18 }
  0x41   :  { %1169 = vmatmul.mubr.bf16.vlgmr.msra.gmra.mxu0 %v1345_v10 }
  0x42   :  { %1172 = vmatprep.mubr.bf16.mxu0 %v1346_v11  ;;  %1217 = vmatpush3.bf16.msra.mxu0 %v1360_v18 }
  0x43   :  { %1218 = vmatprep.subr.bf16.mxu0 %v1361_v19 }
  0x46   :  { %1219 = vmatpush3.bf16.msra.mxu0 %v1361_v19 }
  0x47   :  { %1220 = vmatprep.subr.bf16.mxu0 %v1362_v20 }
  0x49   :  { %1173 = vmatmul.mubr.bf16.gmra.mxu0 %v1347_v12 }
  0x4a   :  { %1176 = vmatprep.mubr.bf16.mxu0 %v1348_v13  ;;  %1221 = vmatpush3.bf16.msra.mxu0 %v1362_v20 }
  0x4b   :  { %1222 = vmatprep.subr.bf16.mxu0 %v1363_v21 }
  0x4e   :  { %1223 = vmatpush3.bf16.msra.mxu0 %v1363_v21 }
  0x4f   :  { %1224 = vmatprep.subr.bf16.mxu0 %v1364_v22 }
  0x51   :  { %1177 = vmatmul.mubr.bf16.gmra.mxu0 %v1349_v14 }
  0x52   :  { %1180 = vmatprep.mubr.bf16.mxu0 %v1350_v15  ;;  %1225 = vmatpush3.bf16.msra.mxu0 %v1364_v22 }
  0x53   :  { %1226 = vmatprep.subr.bf16.mxu0 %v1365_v54 }
  0x56   :  { %1227 = vmatpush3.bf16.msra.mxu0 %v1365_v54 }
  0x57   :  { %1228 = vmatprep.subr.bf16.mxu0 %v1366_v55 }
  0x59   :  { %1181 = vmatmul.mubr.bf16.gmra.mxu0 %v1351_v16 }
  0x5a   :  { %1229 = vmatpush3.bf16.msra.mxu0 %v1366_v55 }
  0x5b   :  { %1230 = vmatprep.subr.bf16.mxu0 %v1367_v56 }
  0x5e   :  { %1231 = vmatpush3.bf16.msra.mxu0 %v1367_v56 }
 0x101   :  { %v1170_v23 = vpop.f32.mrf.mxu0 }
 0x103   :  { %v248_v24 = vpop.f32.mrf.mxu0 }
 0x105   :  { %v1171_v25 = vpop.f32.mrf.mxu0 }
 0x106   :  { %v312_v45 = vpack.c.bf16 %v1171_v25, %v1170_v23 }
 0x107   :  { %v251_v26 = vpop.f32.mrf.mxu0 }
 0x108   :  { %v311_v46 = vpack.c.bf16 %v251_v26, %v248_v24 }
 0x109   :  { %v1174_v27 = vpop.f32.mrf.mxu0 }
 0x10b   :  { %v264_v28 = vpop.f32.mrf.mxu0 }
 0x10d   :  { %v1175_v29 = vpop.f32.mrf.mxu0 }
 0x10e   :  { %v314_v43 = vpack.c.bf16 %v1175_v29, %v1174_v27 }
 0x10f   :  { %v267_v30 = vpop.f32.mrf.mxu0 }
 0x110   :  { %v313_v44 = vpack.c.bf16 %v267_v30, %v264_v28 }
 0x111   :  { %v1178_v31 = vpop.f32.mrf.mxu0 }
 0x113   :  { %v280_v32 = vpop.f32.mrf.mxu0 }
 0x115   :  { %v1179_v33 = vpop.f32.mrf.mxu0 }
 0x116   :  { %v316_v41 = vpack.c.bf16 %v1179_v33, %v1178_v31 }
 0x117   :  { %v283_v34 = vpop.f32.mrf.mxu0 }
 0x118   :  { %v315_v42 = vpack.c.bf16 %v283_v34, %v280_v32 }
 0x119   :  { %v1182_v35 = vpop.f32.mrf.mxu0 }
 0x11b   :  { %v296_v36 = vpop.f32.mrf.mxu0 }
 0x11d   :  { %v1183_v37 = vpop.f32.mrf.mxu0 }
 0x11e   :  { %v318_v38 = vpack.c.bf16 %v1183_v37, %v1182_v35 }
 0x11f   :  { %v299_v39 = vpop.f32.mrf.mxu0 }
 0x120   :  { %v317_v40 = vpack.c.bf16 %v299_v39, %v296_v36  ;;  %1184 = vmatprep.subr.bf16.mxu1 %v318_v38 }
 0x121   :  { %1185 = vmatpush3.bf16.msra.mxu1 %v318_v38 }
 0x122   :  { %1186 = vmatprep.subr.bf16.mxu1 %v317_v40 }
 0x125   :  { %1187 = vmatpush3.bf16.msra.mxu1 %v317_v40 }
 0x126   :  { %1188 = vmatprep.subr.bf16.mxu1 %v316_v41 }
 0x129   :  { %1189 = vmatpush3.bf16.msra.mxu1 %v316_v41 }
 0x12a   :  { %1190 = vmatprep.subr.bf16.mxu1 %v315_v42 }
 0x12d   :  { %1191 = vmatpush3.bf16.msra.mxu1 %v315_v42 }
 0x12e   :  { %1192 = vmatprep.subr.bf16.mxu1 %v314_v43 }
 0x131   :  { %1193 = vmatpush3.bf16.msra.mxu1 %v314_v43 }
 0x132   :  { %1194 = vmatprep.subr.bf16.mxu1 %v313_v44 }
 0x135   :  { %1195 = vmatpush3.bf16.msra.mxu1 %v313_v44 }
 0x136   :  { %1196 = vmatprep.subr.bf16.mxu1 %v312_v45 }
 0x139   :  { %1197 = vmatpush3.bf16.msra.mxu1 %v312_v45 }
 0x13a   :  { %1198 = vmatprep.subr.bf16.mxu1 %v311_v46 }
 0x13d   :  { %1199 = vmatpush3.bf16.msra.mxu1 %v311_v46 }
 0x140   :  { %1201 = vmatmul.mubr.bf16.vlgmr.msra.gmra.mxu1 %v1574_v47 }
 0x141   :  { %1204 = vmatprep.mubr.bf16.mxu1 %v1579_v48 }
 0x148   :  { %1205 = vmatmul.mubr.bf16.gmra.mxu1 %v1586_v49 }
 0x149   :  { %1208 = vmatprep.mubr.bf16.mxu1 %v1591_v50 }
 0x150   :  { %1209 = vmatmul.mubr.bf16.gmra.mxu1 %v1598_v51 }
 0x151   :  { %1212 = vmatprep.mubr.bf16.mxu1 %v1603_v52 }
 0x158   :  { %1213 = vmatmul.mubr.bf16.gmra.mxu1 %v1610_v53 }
 0x159   :  { %1264 = vmatprep.mubr.bf16.mxu1 %v1553_v17 }
 0x200   :  { %v1202_v57 = vpop.f32.mrf.mxu1 }
 0x201   :  { %v417_v63 = vadd.f32 %v1202_v57, %v1039_v59 }
 0x202   :  { %v408_v58 = vpop.f32.mrf.mxu1 }
 0x203   :  { %v409_v61 = vadd.f32 %v1039_v59, %v408_v58  ;;  %v473_v6 = vmax.f32 %v417_v63, 0.0 }
 0x204   :  { %v1203_v60 = vpop.f32.mrf.mxu1 }
 0x205   :  { %v420_v62 = vadd.f32 %v1203_v60, %v1039_v59  ;;  %v471_v4 = vmax.f32 %v409_v61, 0.0 }
 0x206   :  { %v411_v0 = vpop.f32.mrf.mxu1 }
 0x207   :  { %v412_v1 = vadd.f32 %v1039_v59, %v411_v0  ;;  %v474_v2 = vmax.f32 %v420_v62, 0.0 }
 0x208   :  { %v1206_v3 = vpop.f32.mrf.mxu1 }
 0x209   :  { %v472_v5 = vmax.f32 %v412_v1, 0.0  ;;  %v488_v9 = vpack.c.bf16 %v474_v2, %v473_v6  ;;  %v433_v13 = vadd.f32 %v1206_v3, %v1039_v59 }
 0x20a   :  { %v424_v7 = vpop.f32.mrf.mxu1 }
 0x20b   :  { %v487_v8 = vpack.c.bf16 %v472_v5, %v471_v4  ;;  %v425_v11 = vadd.f32 %v1039_v59, %v424_v7  ;;  %v477_v20 = vmax.f32 %v433_v13, 0.0 }
 0x20c   :  { %v1207_v10 = vpop.f32.mrf.mxu1 }
 0x20d   :  { %v436_v12 = vadd.f32 %v1207_v10, %v1039_v59  ;;  %1232 = vmatprep.mubr.bf16.mxu0 %v487_v8  ;;  %v475_v18 = vmax.f32 %v425_v11, 0.0 }
 0x20e   :  { %v427_v14 = vpop.f32.mrf.mxu1  ;;  %1233 = vmatmul.mubr.bf16.vlgmr.msra.gmra.mxu0 %v488_v9 }
 0x20f   :  { %v428_v15 = vadd.f32 %v1039_v59, %v427_v14  ;;  %v478_v16 = vmax.f32 %v436_v12, 0.0 }
 0x210   :  { %v1210_v17 = vpop.f32.mrf.mxu1 }
 0x211   :  { %v476_v19 = vmax.f32 %v428_v15, 0.0  ;;  %v490_v23 = vpack.c.bf16 %v478_v16, %v477_v20  ;;  %v449_v27 = vadd.f32 %v1210_v17, %v1039_v59  ;;  %v784_v17 = vld [vmem:[#allocation3] sm:$0xff] }
 0x212   :  { %v440_v21 = vpop.f32.mrf.mxu1 }
 0x213   :  { %v489_v22 = vpack.c.bf16 %v476_v19, %v475_v18  ;;  %v441_v25 = vadd.f32 %v1039_v59, %v440_v21  ;;  %v481_v34 = vmax.f32 %v449_v27, 0.0  ;;  %v864_v18 = vld [vmem:[%s1673_s7 + $0x18] sm:$0xff] }
 0x214   :  { %v1211_v24 = vpop.f32.mrf.mxu1 }
 0x215   :  { %v452_v26 = vadd.f32 %v1211_v24, %v1039_v59  ;;  %1236 = vmatprep.mubr.bf16.mxu0 %v489_v22  ;;  %v479_v32 = vmax.f32 %v441_v25, 0.0 }
 0x216   :  { %v443_v28 = vpop.f32.mrf.mxu1  ;;  %1237 = vmatmul.mubr.bf16.gmra.mxu0 %v490_v23 }
 0x217   :  { %v444_v29 = vadd.f32 %v1039_v59, %v443_v28  ;;  %v482_v30 = vmax.f32 %v452_v26, 0.0 }
 0x218   :  { %v1214_v31 = vpop.f32.mrf.mxu1 }
 0x219   :  { %v480_v33 = vmax.f32 %v444_v29, 0.0  ;;  %v492_v37 = vpack.c.bf16 %v482_v30, %v481_v34  ;;  %v465_v41 = vadd.f32 %v1214_v31, %v1039_v59  ;;  %v1056_v29 = vld [vmem:[%s1672_s6] ss:$0 sm:$0xff] }
 0x21a   :  { %v456_v35 = vpop.f32.mrf.mxu1 }
 0x21b   :  { %v491_v36 = vpack.c.bf16 %v480_v33, %v479_v32  ;;  %v457_v39 = vadd.f32 %v1039_v59, %v456_v35  ;;  %v485_v54 = vmax.f32 %v465_v41, 0.0 }
 0x21c   :  { %v1215_v38 = vpop.f32.mrf.mxu1 }
 0x21d   :  { %v468_v40 = vadd.f32 %v1215_v38, %v1039_v59  ;;  %1240 = vmatprep.mubr.bf16.mxu0 %v491_v36  ;;  %v483_v45 = vmax.f32 %v457_v39, 0.0 }
 0x21e   :  { %v459_v42 = vpop.f32.mrf.mxu1  ;;  %1241 = vmatmul.mubr.bf16.gmra.mxu0 %v492_v37 }
 0x21f   :  { %v460_v43 = vadd.f32 %v1039_v59, %v459_v42  ;;  %v486_v44 = vmax.f32 %v468_v40, 0.0 }
 0x221   :  { %v484_v46 = vmax.f32 %v460_v43, 0.0  ;;  %v494_v56 = vpack.c.bf16 %v486_v44, %v485_v54 }
 0x223   :  { %v493_v55 = vpack.c.bf16 %v484_v46, %v483_v45 }
 0x225   :  { %1244 = vmatprep.mubr.bf16.mxu0 %v493_v55 }
 0x226   :  { %1245 = vmatmul.mubr.bf16.gmra.mxu0 %v494_v56 }
 0x227   :  { %1312 = vmatprep.mubr.f32.mxu0 %v784_v17  ;;  %v1060_v17 = vld [vmem:[%s1675_s9] ss:$0 sm:$0xff] }
 0x2ce   :  { %v1234_v57 = vpop.f32.mrf.mxu0 }
 0x2d0   :  { %v593_v58 = vpop.f32.mrf.mxu0 }
 0x2d2   :  { %v1235_v60 = vpop.f32.mrf.mxu0 }
 0x2d3   :  { %v657_v15 = vpack.c.bf16 %v1235_v60, %v1234_v57 }
 0x2d4   :  { %v596_v61 = vpop.f32.mrf.mxu0 }
 0x2d5   :  { %v656_v16 = vpack.c.bf16 %v596_v61, %v593_v58 }
 0x2d6   :  { %v1238_v62 = vpop.f32.mrf.mxu0 }
 0x2d8   :  { %v609_v63 = vpop.f32.mrf.mxu0 }
 0x2da   :  { %v1239_v0 = vpop.f32.mrf.mxu0 }
 0x2db   :  { %v659_v13 = vpack.c.bf16 %v1239_v0, %v1238_v62 }
 0x2dc   :  { %v612_v1 = vpop.f32.mrf.mxu0 }
 0x2dd   :  { %v658_v14 = vpack.c.bf16 %v612_v1, %v609_v63 }
 0x2de   :  { %v1242_v2 = vpop.f32.mrf.mxu0 }
 0x2e0   :  { %v625_v3 = vpop.f32.mrf.mxu0 }
 0x2e2   :  { %v1243_v4 = vpop.f32.mrf.mxu0 }
 0x2e3   :  { %v661_v11 = vpack.c.bf16 %v1243_v4, %v1242_v2 }
 0x2e4   :  { %v628_v59 = vpop.f32.mrf.mxu0 }
 0x2e5   :  { %v660_v12 = vpack.c.bf16 %v628_v59, %v625_v3 }
 0x2e6   :  { %v1246_v5 = vpop.f32.mrf.mxu0 }
 0x2e8   :  { %v641_v6 = vpop.f32.mrf.mxu0 }
 0x2ea   :  { %v1247_v7 = vpop.f32.mrf.mxu0 }
 0x2eb   :  { %v663_v8 = vpack.c.bf16 %v1247_v7, %v1246_v5  ;;  %v785_v7 = vld [vmem:[#allocation3 + $0x8] sm:$0xff] }
 0x2ec   :  { %v644_v9 = vpop.f32.mrf.mxu0 }
 0x2ed   :  { %v662_v10 = vpack.c.bf16 %v644_v9, %v641_v6  ;;  %1248 = vmatprep.subr.bf16.mxu1 %v663_v8 }
 0x2ee   :  { %1249 = vmatpush3.bf16.msra.mxu1 %v663_v8 }
 0x2ef   :  { %1250 = vmatprep.subr.bf16.mxu1 %v662_v10 }
 0x2f2   :  { %1251 = vmatpush3.bf16.msra.mxu1 %v662_v10  ;;  %v1057_v10 = vld [vmem:[%s1674_s8] ss:$0 sm:$0xff]  ;;  %s1453_s8 = smov [#allocation8]  }
 0x2f3   :  { %1252 = vmatprep.subr.bf16.mxu1 %v661_v11  ;;  %s1010_s9 = sshll.u32 %s1453_s8, 4  ;;  %s1011_s9 = int_to_ptr.vmem [resolvable:$true] %s1010_s9 }
 0x2f4   :  { %s1420_s29 = scalar_lea.vmem %s1011_s9, 256  ;;  %p1425_p11 = scmp.lt.s32.totalorder %s1011_s9, %s1011_s9 }
 0x2f5   :  { %p1421_p10 = scmp.ne.s32.totalorder %s1011_s9, %s1420_s29  ;;  %p1426_p12 = scmp.lt.s32.totalorder %s1420_s29, %s1420_s29 }
 0x2f6   :  { %1253 = vmatpush3.bf16.msra.mxu1 %v661_v11 }
 0x2f7   :  { %1254 = vmatprep.subr.bf16.mxu1 %v660_v12  ;;  %p1427_p13 = por %p1426_p12, %p1425_p11 }
 0x2f9   :  { %p1428_p0 = pnand %p1427_p13, %p1421_p10 }
 0x2fa   :  { %1255 = vmatpush3.bf16.msra.mxu1 %v660_v12 }
 0x2fb   :  { %1256 = vmatprep.subr.bf16.mxu1 %v659_v13 }
 0x2fe   :  { %1257 = vmatpush3.bf16.msra.mxu1 %v659_v13 }
 0x2ff   :  { %1258 = vmatprep.subr.bf16.mxu1 %v658_v14 }
 0x302   :  { %1259 = vmatpush3.bf16.msra.mxu1 %v658_v14 }
 0x303   :  { %1260 = vmatprep.subr.bf16.mxu1 %v657_v15 }
 0x306   :  { %1261 = vmatpush3.bf16.msra.mxu1 %v657_v15 }
 0x307   :  { %1262 = vmatprep.subr.bf16.mxu1 %v656_v16 }
 0x30a   :  { %1263 = vmatpush3.bf16.msra.mxu1 %v656_v16 }
 0x30b   :  { %1315 = vmatprep.subr.mxu1 %v864_v18 }
 0x30d   :  { %1265 = vmatmul.mubr.bf16.vlgmr.msra.gmra.mxu1 %v1574_v47  ;;  %v863_v47 = vld [vmem:[%s1673_s7 + $0x10] sm:$0xff] }
 0x30e   :  { %1268 = vmatprep.mubr.bf16.mxu1 %v1579_v48  ;;  %1316 = vmatpush3.msra.mxu1 %v864_v18  ;;  %v862_v48 = vld [vmem:[%s1673_s7 + $0x8] sm:$0xff] }
 0x30f   :  { %1317 = vmatprep.subr.mxu1 %v863_v47 }
 0x310   :  { %1318 = vmatpush3.msra.mxu1 %v863_v47 }
 0x311   :  { %1319 = vmatprep.subr.mxu1 %v862_v48 }
 0x312   :  { %1320 = vmatpush3.msra.mxu1 %v862_v48 }
 0x315   :  { %1269 = vmatmul.mubr.bf16.gmra.mxu1 %v1586_v49  ;;  %v861_v49 = vld [vmem:[%s1673_s7] sm:$0xff] }
 0x316   :  { %1272 = vmatprep.mubr.bf16.mxu1 %v1591_v50  ;;  %1321 = vmatprep.subr.mxu1 %v861_v49 }
 0x317   :  { %1322 = vmatpush3.msra.mxu1 %v861_v49 }
 0x31d   :  { %1273 = vmatmul.mubr.bf16.gmra.mxu1 %v1598_v51 }
 0x31e   :  { %1276 = vmatprep.mubr.bf16.mxu1 %v1603_v52 }
 0x325   :  { %1277 = vmatmul.mubr.bf16.gmra.mxu1 %v1610_v53 }
 0x3cd   :  { %v1266_v50 = vpop.f32.mrf.mxu1 }
 0x3ce   :  { %v714_v0 = vadd.f32 %v1266_v50, %v1056_v29  ;;  %v1452_v50 = vmov 0  }
 0x3cf   :  { %v1645_v51 = vpop.f32.mrf.mxu1  ;;  %1334 = vset.pattern.permute.xlu1 %v1452_v50  ;;  %1335 = vset.pattern.permute.xlu0 %v1452_v50 }
 0x3d0   :  { %v770_v4 = vmax.f32 %v714_v0, 0.0  ;;  %v706_v59 = vadd.f32 %v1056_v29, %v1645_v51  ;;  %v1061_v51 = vld [vmem:[#allocation2] ss:$0 sm:$0xff] }
 0x3d1   :  { %v1267_v52 = vpop.f32.mrf.mxu1 }
 0x3d2   :  { %v717_v62 = vadd.f32 %v1267_v52, %v1056_v29  ;;  %v768_v6 = vmax.f32 %v706_v59, 0.0 }
 0x3d3   :  { %v1647_v53 = vpop.f32.mrf.mxu1 }
 0x3d4   :  { %v771_v2 = vmax.f32 %v717_v62, 0.0  ;;  %v709_v3 = vadd.f32 %v1056_v29, %v1647_v53 }
 0x3d5   :  { %v1270_v19 = vpop.f32.mrf.mxu1 }
 0x3d6   :  { %v730_v55 = vadd.f32 %v1270_v19, %v1056_v29  ;;  %v769_v5 = vmax.f32 %v709_v3, 0.0 }
 0x3d7   :  { %v721_v20 = vpop.f32.mrf.mxu1 }
 0x3d8   :  { %v774_v60 = vmax.f32 %v730_v55, 0.0  ;;  %v722_v61 = vadd.f32 %v1056_v29, %v721_v20 }
 0x3d9   :  { %v1271_v21 = vpop.f32.mrf.mxu1 }
 0x3da   :  { %v733_v46 = vadd.f32 %v1271_v21, %v1056_v29  ;;  %v772_v1 = vmax.f32 %v722_v61, 0.0 }
 0x3db   :  { %v724_v22 = vpop.f32.mrf.mxu1 }
 0x3dc   :  { %v775_v57 = vmax.f32 %v733_v46, 0.0  ;;  %v725_v58 = vadd.f32 %v1056_v29, %v724_v22 }
 0x3dd   :  { %v1274_v23 = vpop.f32.mrf.mxu1 }
 0x3de   :  { %v746_v40 = vadd.f32 %v1274_v23, %v1056_v29  ;;  %v773_v63 = vmax.f32 %v725_v58, 0.0 }
 0x3df   :  { %v737_v24 = vpop.f32.mrf.mxu1 }
 0x3e0   :  { %v778_v44 = vmax.f32 %v746_v40, 0.0  ;;  %v738_v45 = vadd.f32 %v1056_v29, %v737_v24 }
 0x3e1   :  { %v1275_v25 = vpop.f32.mrf.mxu1 }
 0x3e2   :  { %v749_v38 = vadd.f32 %v1275_v25, %v1056_v29  ;;  %v776_v56 = vmax.f32 %v738_v45, 0.0 }
 0x3e3   :  { %v740_v26 = vpop.f32.mrf.mxu1 }
 0x3e4   :  { %v779_v42 = vmax.f32 %v749_v38, 0.0  ;;  %v741_v43 = vadd.f32 %v1056_v29, %v740_v26 }
 0x3e5   :  { %v1278_v27 = vpop.f32.mrf.mxu1 }
 0x3e6   :  { %v762_v31 = vadd.f32 %v1278_v27, %v1056_v29  ;;  %v777_v54 = vmax.f32 %v741_v43, 0.0 }
 0x3e7   :  { %v753_v28 = vpop.f32.mrf.mxu1 }
 0x3e8   :  { %v782_v36 = vmax.f32 %v762_v31, 0.0  ;;  %v754_v37 = vadd.f32 %v1056_v29, %v753_v28 }
 0x3e9   :  { %v1279_v30 = vpop.f32.mrf.mxu1 }
 0x3ea   :  { %v765_v32 = vadd.f32 %v1279_v30, %v1056_v29  ;;  %v780_v41 = vmax.f32 %v754_v37, 0.0 }
 0x3eb   :  { %v756_v33 = vpop.f32.mrf.mxu1 }
 0x3ec   :  { %v783_v34 = vmax.f32 %v765_v32, 0.0  ;;  %v757_v35 = vadd.f32 %v1056_v29, %v756_v33 }
 0x3ee   :  { %1280 = vmatprep.subr.mxu0 %v783_v34  ;;  %v781_v39 = vmax.f32 %v757_v35, 0.0 }
 0x3ef   :  { %1281 = vmatpush3.msra.mxu0 %v783_v34 }
 0x3f0   :  { %1282 = vmatprep.subr.mxu0 %v782_v36 }
 0x3f1   :  { %1283 = vmatpush3.msra.mxu0 %v782_v36 }
 0x3f2   :  { %1284 = vmatprep.subr.mxu0 %v781_v39 }
 0x3f3   :  { %1285 = vmatpush3.msra.mxu0 %v781_v39 }
 0x3f4   :  { %1286 = vmatprep.subr.mxu0 %v780_v41 }
 0x3f5   :  { %1287 = vmatpush3.msra.mxu0 %v780_v41 }
 0x3f6   :  { %1288 = vmatprep.subr.mxu0 %v779_v42 }
 0x3f7   :  { %1289 = vmatpush3.msra.mxu0 %v779_v42 }
 0x3f8   :  { %1290 = vmatprep.subr.mxu0 %v778_v44 }
 0x3f9   :  { %1291 = vmatpush3.msra.mxu0 %v778_v44 }
 0x3fa   :  { %1292 = vmatprep.subr.mxu0 %v777_v54 }
 0x3fb   :  { %1293 = vmatpush3.msra.mxu0 %v777_v54 }
 0x3fc   :  { %1294 = vmatprep.subr.mxu0 %v776_v56 }
 0x3fd   :  { %1295 = vmatpush3.msra.mxu0 %v776_v56 }
 0x3fe   :  { %1296 = vmatprep.subr.mxu0 %v775_v57 }
 0x3ff   :  { %1297 = vmatpush3.msra.mxu0 %v775_v57 }
 0x400   :  { %1298 = vmatprep.subr.mxu0 %v774_v60 }
 0x401   :  { %1299 = vmatpush3.msra.mxu0 %v774_v60 }
 0x402   :  { %1300 = vmatprep.subr.mxu0 %v773_v63 }
 0x403   :  { %1301 = vmatpush3.msra.mxu0 %v773_v63 }
 0x404   :  { %1302 = vmatprep.subr.mxu0 %v772_v1 }
 0x405   :  { %1303 = vmatpush3.msra.mxu0 %v772_v1 }
 0x406   :  { %1304 = vmatprep.subr.mxu0 %v771_v2 }
 0x407   :  { %1305 = vmatpush3.msra.mxu0 %v771_v2 }
 0x408   :  { %1306 = vmatprep.subr.mxu0 %v770_v4 }
 0x409   :  { %1307 = vmatpush3.msra.mxu0 %v770_v4 }
 0x40a   :  { %1308 = vmatprep.subr.mxu0 %v769_v5 }
 0x40b   :  { %1309 = vmatpush3.msra.mxu0 %v769_v5 }
 0x40c   :  { %1310 = vmatprep.subr.mxu0 %v768_v6 }
 0x40d   :  { %1311 = vmatpush3.msra.mxu0 %v768_v6 }
 0x40e   :  { %1313 = vmatmul.mubr.f32.vlgmr.msra.gmra.mxu0 %v785_v7 }
 0x4ce   :  { %v1314_v8 = vpop.f32.mrf.mxu0 }
 0x4d0   :  { %v852_v9 = vpop.f32.mrf.mxu0 }
 0x4d1   :  { %1323 = vmatprep.mubr.msk.f32.mxu1 %vm872_vm0, %v852_v9 }
 0x4d2   :  { %1324 = vmatmul.mubr.msk.f32.vlgmr.msra.gmra.mxu1 %vm872_vm0, %v1314_v8 }
 0x592   :  { %v1325_v11 = vpop.f32.mrf.mxu1 }
 0x593   :  { %v951_v12 = vadd.f32 %v1325_v11, %v1057_v10 }
 0x594   :  { %v945_v13 = vpop.f32.mrf.mxu1 }
 0x595   :  { %v946_v14 = vadd.f32 %v1057_v10, %v945_v13  ;;  %1368 = vtanh.f32 %v951_v12 }
 0x597   :  { %1370 = vtanh.f32 %v946_v14 }
 0x5a2   :  { %v1369_v15 = vpop.eup %1368 }
 0x5a3   :  { %v964_v48 = vmul.f32 %v1369_v15, %v1060_v17 }
 0x5a4   :  { %v1371_v16 = vpop.eup %1370 }
 0x5a5   :  { %v963_v18 = vmul.f32 %v1371_v16, %v1060_v17  ;;  %v969_v49 = vsel %vm965_vm1, %v964_v48, 0.0 }
 0x5a7   :  { %v966_v47 = vsel %vm965_vm1, %v963_v18, 0.0 }
 0x5a8   :  { %967 = vadd.xlane.f32.xlu0 %v966_v47 }
 0x5ac   :  { %970 = vadd.xlane.f32.xlu0 %v969_v49 }
 0x631   :  { %v968_v52 = vpop.xlane.xlu0 %967 }
 0x632   :  { %v979_v53 = vadd.f32 %v1061_v51, %v968_v52 }
 0x634   :  { %v1062_v19 = vmul.f32 -1.442695, %v979_v53 }
 0x635   :  { %v971_v20 = vpop.xlane.xlu0 %970 }
 0x636   :  { %1372 = vpow2.f32 %v1062_v19  ;;  %v980_v21 = vadd.f32 %v1061_v51, %v971_v20 }
 0x638   :  { %v1063_v22 = vmul.f32 -1.442695, %v980_v21 }
 0x63a   :  { %1374 = vpow2.f32 %v1063_v22 }
 0x643   :  { %v1373_v23 = vpop.eup %1372 }
 0x644   :  { %v987_v24 = vadd.f32 1.0, %v1373_v23 }
 0x646   :  { %1376 = vrcp.f32 %v987_v24 }
 0x647   :  { %v1375_v25 = vpop.eup %1374 }
 0x648   :  { %v988_v26 = vadd.f32 1.0, %v1375_v25 }
 0x64a   :  { %1378 = vrcp.f32 %v988_v26 }
 0x653   :  { %v1377_v27 = vpop.eup %1376 }
 0x654   :  { %995 = vperm.xlu1 %1334, %v1377_v27  }
 0x657   :  { %v1379_v28 = vpop.eup %1378 }
 0x658   :  { %1000 = vperm.xlu1 %1334, %v1379_v28  }
 0x6cf   :  { %v996_v29 = vpop.permute.xlu1 %995 }
 0x6d0   :  { %1003 = vst [vmem:[#allocation8] sm:$0xff] %v996_v29 }
 0x6d3   :  { %v1001_v30 = vpop.permute.xlu1 %1000 }
 0x6d4   :  { %1004 = vst [vmem:[#allocation8 + $0x8] sm:$0xff] %v1001_v30 }
 0x6d5   :  { %1431 = shalt.err (!%p1428_p0)
}
 0x6d6   :  { %1016 = dma.vmem_to_hbm [thread:$0]  %s1011_s9, 256, %s1677_s11, [#allocation5], %s1447_s22, %s1447_s22, %s1448_s23  }
 0x6d7   :  { %1444 = dma.done.wait [#allocation5], 256  }
 0x6d8   :  { %1445 = vsyncadd [#allocation5], 4294967040 }
 0x6d9   :  { %1020 = vsyncpa [#allocation4], 1 }
 0x6da   :  { %1021 = vsyncpa [#allocation7], 1 }
 0x6db   :  { %1022 = vsyncpa [#allocation5], 1 }

</bundles_post_ra>
